<compile_context>
chip_gen: v5e
topology: v5e:2x2
jax: 0.10.0
libtpu: 0.0.40
codegen_flags: <defaults>
</compile_context>

<pallas_src>
import functools

import jax
import jax.numpy as jnp
from jax.experimental import pallas as pl
from jax.experimental.pallas import tpu as pltpu

# Python float (NOT a jnp array) so it lowers as a scalar literal inside the
# kernel instead of being captured as a closed-over constant (previous bug).
NEG_INF = float(-2 ** 32 + 1)  # matches torch: -2 ** 32 + 1


# ----------------------------------------------------------------------------
# Pallas kernel: attention (DIN activation unit) + deep MLP for TB batch rows.
# ----------------------------------------------------------------------------
def din_kernel(
    u_ref,      # (TB, Fu)     f32  user features
    q_ref,      # (TB, Fi)     f32  candidate item features (attention query)
    keys_ref,   # (TB, L, Fi)  f32  behaviour-sequence item features
    slen_ref,   # (TB, 1)      i32  valid sequence length
    aw1_ref, ab1_ref,    # (4*Fi, H1) bf16, (1, H1) f32
    aw2_ref, ab2_ref,    # (H1, H2)   bf16, (1, H2) f32
    aw3t_ref, ab3_ref,   # (1, H2)    f32,  (1, 1)  f32  (width-1 layer, VPU)
    dw1_ref, db1_ref,    # (Fu+2*Fi, D1) bf16, (1, D1) f32
    dw2_ref, db2_ref,    # (D1, D2)      bf16, (1, D2) f32
    dw3t_ref, db3_ref,   # (1, D2)       f32,  (1, 1)  f32 (width-1 layer, VPU)
    out_ref,    # (TB, 128)    f32  prediction broadcast across lanes
    *,
    sigmoid_out: bool,
):
    bf16 = jnp.bfloat16
    u = u_ref[...]
    q = q_ref[...]
    keys3 = keys_ref[...]
    TB, L, Fi = keys3.shape

    # Flatten (TB, L) onto the sublane axis -> one big attention-MLP matmul.
    # (L equals the sublane tile, so this reshape is layout-preserving.)
    keys = keys3.reshape(TB * L, Fi)
    qe = jnp.broadcast_to(q[:, None, :], (TB, L, Fi)).reshape(TB * L, Fi)

    # ---- DIN activation unit: cat([q, k, q-k, q*k]) -> MLP -> logit ----
    att_in = jnp.concatenate([qe, keys, qe - keys, qe * keys], axis=-1)

    h = jnp.dot(att_in.astype(bf16), aw1_ref[...],
                preferred_element_type=jnp.float32) + ab1_ref[...]
    h = jnp.maximum(h, 0.0)
    h = jnp.dot(h.astype(bf16), aw2_ref[...],
                preferred_element_type=jnp.float32) + ab2_ref[...]
    h = jnp.maximum(h, 0.0)
    # Width-1 output layer on the VPU (lane reduce) instead of an N=1 matmul.
    logits = jnp.sum(h * aw3t_ref[...], axis=-1, keepdims=True) + ab3_ref[...]
    logits = logits.reshape(TB, L, 1)             # leading-dim split: free

    # ---- masked softmax along the sequence (sublane) axis ----
    slen = slen_ref[...]                          # (TB, 1) int32
    pos = jax.lax.broadcasted_iota(jnp.int32, (TB, L, 1), 1)
    mask = pos < slen[:, :, None]                 # (TB, L, 1)
    score = jnp.where(mask, logits, NEG_INF)
    m = jnp.max(score, axis=1, keepdims=True)
    e = jnp.exp(score - m)
    p = e / jnp.sum(e, axis=1, keepdims=True)     # (TB, L, 1)

    # ---- weighted pooling of the behaviour sequence ----
    att = jnp.sum(p * keys3, axis=1)              # (TB, Fi)

    # ---- deep MLP over cat([u_x, i_x, att_out]) ----
    deep_in = jnp.concatenate([u, q, att], axis=-1)
    d = jnp.dot(deep_in.astype(bf16), dw1_ref[...],
                preferred_element_type=jnp.float32) + db1_ref[...]
    d = jnp.maximum(d, 0.0)
    d = jnp.dot(d.astype(bf16), dw2_ref[...],
                preferred_element_type=jnp.float32) + db2_ref[...]
    d = jnp.maximum(d, 0.0)
    out = jnp.sum(d * dw3t_ref[...], axis=-1, keepdims=True) + db3_ref[...]

    if sigmoid_out:
        out = jax.nn.sigmoid(out)

    # Lane-dense (128-wide, unmasked) store; the wrapper reads lane 0.
    out_ref[...] = jnp.broadcast_to(out, out_ref.shape)


# ----------------------------------------------------------------------------
# Wrapper: embedding glue in JAX, hot path in the Pallas kernel.
# ----------------------------------------------------------------------------
def din_pallas(u_x, i_x, seq_i_x, seq_len, params, *, sigmoid_out=True, tb=None):
    B, Fu = u_x.shape
    _, Fi = i_x.shape
    _, L, _ = seq_i_x.shape

    # Batch tile: big enough to fill MXU rows (TB*L >= 256 once B >= 32),
    # small enough to leave multiple "parallel" grid steps at realistic B
    # (keeps both v7x TensorCores busy).  Working set is tiny, VMEM is not a
    # constraint on any generation.
    if tb is None:
        tb = min(B, 128)
    n_blocks = pl.cdiv(B, tb)
    b_pad = n_blocks * tb
    pad = b_pad - B

    u2 = jnp.pad(u_x.astype(jnp.float32), ((0, pad), (0, 0)))
    q2 = jnp.pad(i_x.astype(jnp.float32), ((0, pad), (0, 0)))
    k3 = jnp.pad(seq_i_x.astype(jnp.float32), ((0, pad), (0, 0), (0, 0)))
    sl2 = jnp.pad(seq_len.reshape(B, 1).astype(jnp.int32), ((0, pad), (0, 0)))

    f32, bf16 = jnp.float32, jnp.bfloat16
    weights = [
        params["aw1"].astype(bf16), params["ab1"].astype(f32),
        params["aw2"].astype(bf16), params["ab2"].astype(f32),
        params["aw3"].T.astype(f32), params["ab3"].astype(f32),
        params["dw1"].astype(bf16), params["db1"].astype(f32),
        params["dw2"].astype(bf16), params["db2"].astype(f32),
        params["dw3"].T.astype(f32), params["db3"].astype(f32),
    ]

    data_specs = [
        pl.BlockSpec((tb, Fu), lambda b: (b, 0)),       # u
        pl.BlockSpec((tb, Fi), lambda b: (b, 0)),       # q
        pl.BlockSpec((tb, L, Fi), lambda b: (b, 0, 0)), # keys
        pl.BlockSpec((tb, 1), lambda b: (b, 0)),        # seq_len
    ]
    weight_specs = [pl.BlockSpec(w.shape, lambda b: (0, 0)) for w in weights]

    out = pl.pallas_call(
        functools.partial(din_kernel, sigmoid_out=sigmoid_out),
        out_shape=jax.ShapeDtypeStruct((b_pad, 128), jnp.float32),
        grid=(n_blocks,),
        in_specs=data_specs + weight_specs,
        out_specs=pl.BlockSpec((tb, 128), lambda b: (b, 0)),
        compiler_params=pltpu.CompilerParams(
            dimension_semantics=("parallel",)),
    )(u2, q2, k3, sl2, *weights)

    return out[:B, 0]


# ----------------------------------------------------------------------------
# Pure-JAX f32 reference (same semantics as the PyTorch forward).
# ----------------------------------------------------------------------------
def din_reference(u_x, i_x, seq_i_x, seq_len, p, *, sigmoid_out=True):
    B, L, Fi = seq_i_x.shape
    q = jnp.broadcast_to(i_x[:, None, :], (B, L, Fi))
    att_x = jnp.concatenate([q, seq_i_x, q - seq_i_x, q * seq_i_x], axis=-1)
    h = jax.nn.relu(att_x @ p["aw1"] + p["ab1"])
    h = jax.nn.relu(h @ p["aw2"] + p["ab2"])
    logits = (h @ p["aw3"] + p["ab3"])[..., 0]                       # [B, L]
    mask = jnp.arange(L)[None, :] < seq_len[:, None]
    score = jnp.where(mask, logits, NEG_INF)
    score = jax.nn.softmax(score, axis=-1)
    att = jnp.einsum("bl,blf->bf", score, seq_i_x)
    deep_x = jnp.concatenate([u_x, i_x, att], axis=-1)
    d = jax.nn.relu(deep_x @ p["dw1"] + p["db1"])
    d = jax.nn.relu(d @ p["dw2"] + p["db2"])
    d = (d @ p["dw3"] + p["db3"])[:, 0]
    return jax.nn.sigmoid(d) if sigmoid_out else d


# ----------------------------------------------------------------------------
# Deterministic parameter / input construction and a single run.
# ----------------------------------------------------------------------------
def _linear(key, fan_in, fan_out):
    k1, k2 = jax.random.split(key)
    w = jax.random.normal(k1, (fan_in, fan_out), jnp.float32) * 0.1
    b = jax.random.normal(k2, (1, fan_out), jnp.float32) * 0.01
    return w, b


if __name__ == "__main__":
    # --- module config (small) ---
    B, L, E = 4, 8, 8                                  # batch, max_seq_len, embed_dim
    user_sparse_nums = [100, 50]                       # 2 user sparse feats
    n_user_dense = 1
    item_sparse_nums = [200, 80]                       # 2 item sparse feats
    n_item_dense = 2
    attention_layers = [32, 16, 1]
    deep_layers = [64, 32, 1]
    sigmoid_out = True

    Fu = len(user_sparse_nums) * E + n_user_dense      # user_feat_num = 17
    Fi = len(item_sparse_nums) * E + n_item_dense      # item_feat_num = 18
    deep_in = Fu + 2 * Fi                              # 53

    root = jax.random.PRNGKey(0)
    keys = jax.random.split(root, 32)

    # embedding tables (SparseEmbeddingLayer)
    u_tables = [jax.random.normal(keys[i], (n, E), jnp.float32) * 0.1
                for i, n in enumerate(user_sparse_nums)]
    i_tables = [jax.random.normal(keys[4 + i], (n, E), jnp.float32) * 0.1
                for i, n in enumerate(item_sparse_nums)]

    # attention DNN: 4*Fi -> 32 -> 16 -> 1
    aw1, ab1 = _linear(keys[8], 4 * Fi, attention_layers[0])
    aw2, ab2 = _linear(keys[9], attention_layers[0], attention_layers[1])
    aw3, ab3 = _linear(keys[10], attention_layers[1], attention_layers[2])
    # deep DNN: 53 -> 64 -> 32 -> 1
    dw1, db1 = _linear(keys[11], deep_in, deep_layers[0])
    dw2, db2 = _linear(keys[12], deep_layers[0], deep_layers[1])
    dw3, db3 = _linear(keys[13], deep_layers[1], deep_layers[2])
    params = dict(aw1=aw1, ab1=ab1, aw2=aw2, ab2=ab2, aw3=aw3, ab3=ab3,
                  dw1=dw1, db1=db1, dw2=dw2, db2=db2, dw3=dw3, db3=db3)

    # --- raw DIN inputs ---
    user_sparse = jax.random.randint(keys[16], (B, 2), 0, 50)            # [B, 2]
    user_dense = jax.random.normal(keys[17], (B, n_user_dense), jnp.float32)
    item_sparse = jax.random.randint(keys[18], (B, 2), 0, 80)            # [B, 2]
    item_dense = jax.random.normal(keys[19], (B, n_item_dense), jnp.float32)
    seq_item_sparse = jax.random.randint(keys[20], (B, L, 2), 0, 80)     # [B, L, 2]
    seq_item_dense = jax.random.normal(keys[21], (B, L, n_item_dense), jnp.float32)
    seq_item_length = jax.random.randint(keys[22], (B,), 1, L + 1)       # [B]

    # --- embedding / dense-cat glue (plain JAX) ---
    u_embed = jnp.concatenate(
        [u_tables[f][user_sparse[:, f]] for f in range(len(u_tables))], axis=-1)
    u_x = jnp.concatenate([u_embed, user_dense], axis=-1)                # [B, Fu]

    i_embed = jnp.concatenate(
        [i_tables[f][item_sparse[:, f]] for f in range(len(i_tables))], axis=-1)
    i_x = jnp.concatenate([i_embed, item_dense], axis=-1)                # [B, Fi]

    seq_embed = jnp.concatenate(
        [i_tables[f][seq_item_sparse[:, :, f]] for f in range(len(i_tables))], axis=-1)
    seq_i_x = jnp.concatenate([seq_embed, seq_item_dense], axis=-1)      # [B, L, Fi]

    # --- run Pallas kernel ---
    out = din_pallas(u_x, i_x, seq_i_x, seq_item_length, params,
                     sigmoid_out=sigmoid_out)
    out = jax.block_until_ready(out)

    # --- validate against pure-JAX f32 reference (kernel matmuls are bf16) ---
    ref = din_reference(u_x, i_x, seq_i_x, seq_item_length, params,
                        sigmoid_out=sigmoid_out)
    assert out.shape == (B,), out.shape
    assert jnp.allclose(out, ref, atol=1e-2, rtol=1e-2), (out, ref)

    print("KERNEL_OK")
</pallas_src>

<mosaic_0001>
module attributes {stable_mosaic.version = 11 : i64} {
  func.func @din_kernel(%arg0: i32, %arg1: memref<4x17xf32, #tpu.memory_space<vmem>>, %arg2: memref<4x18xf32, #tpu.memory_space<vmem>>, %arg3: memref<4x8x18xf32, #tpu.memory_space<vmem>>, %arg4: memref<4x1xi32, #tpu.memory_space<vmem>>, %arg5: memref<72x32xbf16, #tpu.memory_space<vmem>>, %arg6: memref<1x32xf32, #tpu.memory_space<vmem>>, %arg7: memref<32x16xbf16, #tpu.memory_space<vmem>>, %arg8: memref<1x16xf32, #tpu.memory_space<vmem>>, %arg9: memref<1x16xf32, #tpu.memory_space<vmem>>, %arg10: memref<1x1xf32, #tpu.memory_space<vmem>>, %arg11: memref<53x64xbf16, #tpu.memory_space<vmem>>, %arg12: memref<1x64xf32, #tpu.memory_space<vmem>>, %arg13: memref<64x32xbf16, #tpu.memory_space<vmem>>, %arg14: memref<1x32xf32, #tpu.memory_space<vmem>>, %arg15: memref<1x32xf32, #tpu.memory_space<vmem>>, %arg16: memref<1x1xf32, #tpu.memory_space<vmem>>, %arg17: memref<4x128xf32, #tpu.memory_space<vmem>>) attributes {dimension_semantics = [#tpu.dimension_semantics<parallel>], iteration_bounds = array<i64: 1>, scalar_prefetch = 0 : i64, scratch_operands = 0 : i64, tpu.core_type = #tpu.core_type<tc>, window_params = [{transform_indices = @transform_0, window_bounds = array<i64: 4, 17>}, {transform_indices = @transform_1, window_bounds = array<i64: 4, 18>}, {transform_indices = @transform_2, window_bounds = array<i64: 4, 8, 18>}, {transform_indices = @transform_3, window_bounds = array<i64: 4, 1>}, {pipeline_mode = #tpu.pipeline_mode<synchronous>, transform_indices = @transform_4, window_bounds = array<i64: 72, 32>}, {pipeline_mode = #tpu.pipeline_mode<synchronous>, transform_indices = @transform_5, window_bounds = array<i64: 1, 32>}, {pipeline_mode = #tpu.pipeline_mode<synchronous>, transform_indices = @transform_6, window_bounds = array<i64: 32, 16>}, {pipeline_mode = #tpu.pipeline_mode<synchronous>, transform_indices = @transform_7, window_bounds = array<i64: 1, 16>}, {pipeline_mode = #tpu.pipeline_mode<synchronous>, transform_indices = @transform_8, window_bounds = array<i64: 1, 16>}, {pipeline_mode = #tpu.pipeline_mode<synchronous>, transform_indices = @transform_9, window_bounds = array<i64: 1, 1>}, {pipeline_mode = #tpu.pipeline_mode<synchronous>, transform_indices = @transform_10, window_bounds = array<i64: 53, 64>}, {pipeline_mode = #tpu.pipeline_mode<synchronous>, transform_indices = @transform_11, window_bounds = array<i64: 1, 64>}, {pipeline_mode = #tpu.pipeline_mode<synchronous>, transform_indices = @transform_12, window_bounds = array<i64: 64, 32>}, {pipeline_mode = #tpu.pipeline_mode<synchronous>, transform_indices = @transform_13, window_bounds = array<i64: 1, 32>}, {pipeline_mode = #tpu.pipeline_mode<synchronous>, transform_indices = @transform_14, window_bounds = array<i64: 1, 32>}, {pipeline_mode = #tpu.pipeline_mode<synchronous>, transform_indices = @transform_15, window_bounds = array<i64: 1, 1>}, {transform_indices = @transform_16, window_bounds = array<i64: 4, 128>}]} {
    %c0 = arith.constant 0 : index
    %c0_0 = arith.constant 0 : index
    %0 = vector.load %arg1[%c0, %c0_0] : memref<4x17xf32, #tpu.memory_space<vmem>>, vector<4x17xf32>
    %c0_1 = arith.constant 0 : index
    %c0_2 = arith.constant 0 : index
    %1 = vector.load %arg2[%c0_1, %c0_2] : memref<4x18xf32, #tpu.memory_space<vmem>>, vector<4x18xf32>
    %c0_3 = arith.constant 0 : index
    %c0_4 = arith.constant 0 : index
    %c0_5 = arith.constant 0 : index
    %2 = vector.load %arg3[%c0_3, %c0_4, %c0_5] : memref<4x8x18xf32, #tpu.memory_space<vmem>>, vector<4x8x18xf32>
    %3 = vector.shape_cast %2 : vector<4x8x18xf32> to vector<32x18xf32>
    %4 = vector.shape_cast %1 : vector<4x18xf32> to vector<4x1x18xf32>
    %5 = vector.shape_cast %4 : vector<4x1x18xf32> to vector<4x1x18xf32>
    %6 = vector.broadcast %5 : vector<4x1x18xf32> to vector<4x8x18xf32>
    %7 = vector.shape_cast %6 : vector<4x8x18xf32> to vector<32x18xf32>
    %8 = arith.subf %7, %3 : vector<32x18xf32>
    %9 = arith.mulf %7, %3 : vector<32x18xf32>
    %10 = tpu.concatenate %7, %3, %8, %9 in 1 : vector<32x18xf32>, vector<32x18xf32>, vector<32x18xf32>, vector<32x18xf32> -> vector<32x72xf32>
    %11 = arith.truncf %10 : vector<32x72xf32> to vector<32x72xbf16>
    %c0_6 = arith.constant 0 : index
    %c0_7 = arith.constant 0 : index
    %12 = vector.load %arg5[%c0_6, %c0_7] : memref<72x32xbf16, #tpu.memory_space<vmem>>, vector<72x32xbf16>
    %cst = arith.constant dense<0.000000e+00> : vector<32x32xf32>
    %13 = tpu.matmul %11, %12, %cst {dimension_numbers = #tpu.dot_dimension_numbers<[1], [0], [0], [1], [0, 0, 1, 1], [], []>} : vector<32x72xbf16>, vector<72x32xbf16>, vector<32x32xf32> -> vector<32x32xf32>
    %c0_8 = arith.constant 0 : index
    %c0_9 = arith.constant 0 : index
    %14 = vector.load %arg6[%c0_8, %c0_9] : memref<1x32xf32, #tpu.memory_space<vmem>>, vector<1x32xf32>
    %15 = vector.broadcast %14 : vector<1x32xf32> to vector<32x32xf32>
    %16 = arith.addf %13, %15 : vector<32x32xf32>
    %cst_10 = arith.constant 0.000000e+00 : f32
    %17 = vector.broadcast %cst_10 : f32 to vector<32x32xf32>
    %18 = arith.maximumf %16, %17 : vector<32x32xf32>
    %19 = arith.truncf %18 : vector<32x32xf32> to vector<32x32xbf16>
    %c0_11 = arith.constant 0 : index
    %c0_12 = arith.constant 0 : index
    %20 = vector.load %arg7[%c0_11, %c0_12] : memref<32x16xbf16, #tpu.memory_space<vmem>>, vector<32x16xbf16>
    %cst_13 = arith.constant dense<0.000000e+00> : vector<32x16xf32>
    %21 = tpu.matmul %19, %20, %cst_13 {dimension_numbers = #tpu.dot_dimension_numbers<[1], [0], [0], [1], [0, 0, 1, 1], [], []>} : vector<32x32xbf16>, vector<32x16xbf16>, vector<32x16xf32> -> vector<32x16xf32>
    %c0_14 = arith.constant 0 : index
    %c0_15 = arith.constant 0 : index
    %22 = vector.load %arg8[%c0_14, %c0_15] : memref<1x16xf32, #tpu.memory_space<vmem>>, vector<1x16xf32>
    %23 = vector.broadcast %22 : vector<1x16xf32> to vector<32x16xf32>
    %24 = arith.addf %21, %23 : vector<32x16xf32>
    %cst_16 = arith.constant 0.000000e+00 : f32
    %25 = vector.broadcast %cst_16 : f32 to vector<32x16xf32>
    %26 = arith.maximumf %24, %25 : vector<32x16xf32>
    %c0_17 = arith.constant 0 : index
    %c0_18 = arith.constant 0 : index
    %27 = vector.load %arg9[%c0_17, %c0_18] : memref<1x16xf32, #tpu.memory_space<vmem>>, vector<1x16xf32>
    %28 = vector.broadcast %27 : vector<1x16xf32> to vector<32x16xf32>
    %29 = arith.mulf %26, %28 : vector<32x16xf32>
    %cst_19 = arith.constant dense<0.000000e+00> : vector<32xf32>
    %30 = vector.multi_reduction <add>, %29, %cst_19 [1] : vector<32x16xf32> to vector<32xf32>
    %31 = vector.shape_cast %30 : vector<32xf32> to vector<32x1xf32>
    %c0_20 = arith.constant 0 : index
    %c0_21 = arith.constant 0 : index
    %32 = vector.load %arg10[%c0_20, %c0_21] : memref<1x1xf32, #tpu.memory_space<vmem>>, vector<1x1xf32>
    %33 = vector.broadcast %32 : vector<1x1xf32> to vector<32x1xf32>
    %34 = arith.addf %31, %33 : vector<32x1xf32>
    %35 = vector.shape_cast %34 : vector<32x1xf32> to vector<4x8x1xf32>
    %c0_22 = arith.constant 0 : index
    %c0_23 = arith.constant 0 : index
    %36 = vector.load %arg4[%c0_22, %c0_23] : memref<4x1xi32, #tpu.memory_space<vmem>>, vector<4x1xi32>
    %37 = tpu.iota {dimensions = array<i32: 1>} : vector<4x8x1xi32>
    %38 = vector.shape_cast %36 : vector<4x1xi32> to vector<4x1x1xi32>
    %39 = vector.broadcast %38 : vector<4x1x1xi32> to vector<4x8x1xi32>
    %40 = arith.cmpi slt, %37, %39 : vector<4x8x1xi32>
    %cst_24 = arith.constant -4.2949673E+9 : f32
    %41 = vector.broadcast %cst_24 : f32 to vector<4x8x1xf32>
    %42 = arith.select %40, %35, %41 : vector<4x8x1xi1>, vector<4x8x1xf32>
    %cst_25 = arith.constant dense<0xFF800000> : vector<4x1xf32>
    %43 = vector.multi_reduction <maximumf>, %42, %cst_25 [1] : vector<4x8x1xf32> to vector<4x1xf32>
    %44 = vector.shape_cast %43 : vector<4x1xf32> to vector<4x1x1xf32>
    %45 = vector.broadcast %44 : vector<4x1x1xf32> to vector<4x8x1xf32>
    %46 = arith.subf %42, %45 : vector<4x8x1xf32>
    %47 = math.exp %46 : vector<4x8x1xf32>
    %cst_26 = arith.constant dense<0.000000e+00> : vector<4x1xf32>
    %48 = vector.multi_reduction <add>, %47, %cst_26 [1] : vector<4x8x1xf32> to vector<4x1xf32>
    %49 = vector.shape_cast %48 : vector<4x1xf32> to vector<4x1x1xf32>
    %50 = vector.broadcast %49 : vector<4x1x1xf32> to vector<4x8x1xf32>
    %51 = arith.divf %47, %50 : vector<4x8x1xf32>
    %52 = vector.broadcast %51 : vector<4x8x1xf32> to vector<4x8x18xf32>
    %53 = arith.mulf %52, %2 : vector<4x8x18xf32>
    %cst_27 = arith.constant dense<0.000000e+00> : vector<4x18xf32>
    %54 = vector.multi_reduction <add>, %53, %cst_27 [1] : vector<4x8x18xf32> to vector<4x18xf32>
    %55 = tpu.concatenate %0, %1, %54 in 1 : vector<4x17xf32>, vector<4x18xf32>, vector<4x18xf32> -> vector<4x53xf32>
    %56 = arith.truncf %55 : vector<4x53xf32> to vector<4x53xbf16>
    %c0_28 = arith.constant 0 : index
    %c0_29 = arith.constant 0 : index
    %57 = vector.load %arg11[%c0_28, %c0_29] : memref<53x64xbf16, #tpu.memory_space<vmem>>, vector<53x64xbf16>
    %cst_30 = arith.constant dense<0.000000e+00> : vector<4x64xf32>
    %58 = tpu.matmul %56, %57, %cst_30 {dimension_numbers = #tpu.dot_dimension_numbers<[1], [0], [0], [1], [0, 0, 1, 1], [], []>} : vector<4x53xbf16>, vector<53x64xbf16>, vector<4x64xf32> -> vector<4x64xf32>
    %c0_31 = arith.constant 0 : index
    %c0_32 = arith.constant 0 : index
    %59 = vector.load %arg12[%c0_31, %c0_32] : memref<1x64xf32, #tpu.memory_space<vmem>>, vector<1x64xf32>
    %60 = vector.broadcast %59 : vector<1x64xf32> to vector<4x64xf32>
    %61 = arith.addf %58, %60 : vector<4x64xf32>
    %cst_33 = arith.constant 0.000000e+00 : f32
    %62 = vector.broadcast %cst_33 : f32 to vector<4x64xf32>
    %63 = arith.maximumf %61, %62 : vector<4x64xf32>
    %64 = arith.truncf %63 : vector<4x64xf32> to vector<4x64xbf16>
    %c0_34 = arith.constant 0 : index
    %c0_35 = arith.constant 0 : index
    %65 = vector.load %arg13[%c0_34, %c0_35] : memref<64x32xbf16, #tpu.memory_space<vmem>>, vector<64x32xbf16>
    %cst_36 = arith.constant dense<0.000000e+00> : vector<4x32xf32>
    %66 = tpu.matmul %64, %65, %cst_36 {dimension_numbers = #tpu.dot_dimension_numbers<[1], [0], [0], [1], [0, 0, 1, 1], [], []>} : vector<4x64xbf16>, vector<64x32xbf16>, vector<4x32xf32> -> vector<4x32xf32>
    %c0_37 = arith.constant 0 : index
    %c0_38 = arith.constant 0 : index
    %67 = vector.load %arg14[%c0_37, %c0_38] : memref<1x32xf32, #tpu.memory_space<vmem>>, vector<1x32xf32>
    %68 = vector.broadcast %67 : vector<1x32xf32> to vector<4x32xf32>
    %69 = arith.addf %66, %68 : vector<4x32xf32>
    %cst_39 = arith.constant 0.000000e+00 : f32
    %70 = vector.broadcast %cst_39 : f32 to vector<4x32xf32>
    %71 = arith.maximumf %69, %70 : vector<4x32xf32>
    %c0_40 = arith.constant 0 : index
    %c0_41 = arith.constant 0 : index
    %72 = vector.load %arg15[%c0_40, %c0_41] : memref<1x32xf32, #tpu.memory_space<vmem>>, vector<1x32xf32>
    %73 = vector.broadcast %72 : vector<1x32xf32> to vector<4x32xf32>
    %74 = arith.mulf %71, %73 : vector<4x32xf32>
    %cst_42 = arith.constant dense<0.000000e+00> : vector<4xf32>
    %75 = vector.multi_reduction <add>, %74, %cst_42 [1] : vector<4x32xf32> to vector<4xf32>
    %76 = vector.shape_cast %75 : vector<4xf32> to vector<4x1xf32>
    %c0_43 = arith.constant 0 : index
    %c0_44 = arith.constant 0 : index
    %77 = vector.load %arg16[%c0_43, %c0_44] : memref<1x1xf32, #tpu.memory_space<vmem>>, vector<1x1xf32>
    %78 = vector.broadcast %77 : vector<1x1xf32> to vector<4x1xf32>
    %79 = arith.addf %76, %78 : vector<4x1xf32>
    %80 = arith.negf %79 : vector<4x1xf32>
    %81 = math.exp %80 : vector<4x1xf32>
    %cst_45 = arith.constant 1.000000e+00 : f32
    %82 = vector.broadcast %cst_45 : f32 to vector<4x1xf32>
    %83 = arith.addf %82, %81 : vector<4x1xf32>
    %84 = arith.divf %82, %83 : vector<4x1xf32>
    %85 = vector.shape_cast %84 : vector<4x1xf32> to vector<4x1xf32>
    %86 = vector.broadcast %85 : vector<4x1xf32> to vector<4x128xf32>
    %c0_46 = arith.constant 0 : index
    %c0_47 = arith.constant 0 : index
    %87 = vector.load %arg17[%c0_46, %c0_47] : memref<4x128xf32, #tpu.memory_space<vmem>>, vector<4x128xf32>
    tpu.vector_store %arg17[%c0_46, %c0_47], %86 {strides = array<i32>} : memref<4x128xf32, #tpu.memory_space<vmem>>, vector<4x128xf32>,
    return
  }
  func.func @transform_0(%arg0: i32) -> (i32, i32) {
    %c0_i32 = arith.constant 0 : i32
    %c0_i32_0 = arith.constant 0 : i32
    return %arg0, %c0_i32 : i32, i32
  }
  func.func @transform_1(%arg0: i32) -> (i32, i32) {
    %c0_i32 = arith.constant 0 : i32
    %c0_i32_0 = arith.constant 0 : i32
    return %arg0, %c0_i32 : i32, i32
  }
  func.func @transform_2(%arg0: i32) -> (i32, i32, i32) {
    %c0_i32 = arith.constant 0 : i32
    %c0_i32_0 = arith.constant 0 : i32
    %c0_i32_1 = arith.constant 0 : i32
    return %arg0, %c0_i32, %c0_i32_0 : i32, i32, i32
  }
  func.func @transform_3(%arg0: i32) -> (i32, i32) {
    %c0_i32 = arith.constant 0 : i32
    %c0_i32_0 = arith.constant 0 : i32
    return %arg0, %c0_i32 : i32, i32
  }
  func.func @transform_4(%arg0: i32) -> (i32, i32) {
    %c0_i32 = arith.constant 0 : i32
    %c0_i32_0 = arith.constant 0 : i32
    %c0_i32_1 = arith.constant 0 : i32
    return %c0_i32, %c0_i32_0 : i32, i32
  }
  func.func @transform_5(%arg0: i32) -> (i32, i32) {
    %c0_i32 = arith.constant 0 : i32
    %c0_i32_0 = arith.constant 0 : i32
    %c0_i32_1 = arith.constant 0 : i32
    return %c0_i32, %c0_i32_0 : i32, i32
  }
  func.func @transform_6(%arg0: i32) -> (i32, i32) {
    %c0_i32 = arith.constant 0 : i32
    %c0_i32_0 = arith.constant 0 : i32
    %c0_i32_1 = arith.constant 0 : i32
    return %c0_i32, %c0_i32_0 : i32, i32
  }
  func.func @transform_7(%arg0: i32) -> (i32, i32) {
    %c0_i32 = arith.constant 0 : i32
    %c0_i32_0 = arith.constant 0 : i32
    %c0_i32_1 = arith.constant 0 : i32
    return %c0_i32, %c0_i32_0 : i32, i32
  }
  func.func @transform_8(%arg0: i32) -> (i32, i32) {
    %c0_i32 = arith.constant 0 : i32
    %c0_i32_0 = arith.constant 0 : i32
    %c0_i32_1 = arith.constant 0 : i32
    return %c0_i32, %c0_i32_0 : i32, i32
  }
  func.func @transform_9(%arg0: i32) -> (i32, i32) {
    %c0_i32 = arith.constant 0 : i32
    %c0_i32_0 = arith.constant 0 : i32
    %c0_i32_1 = arith.constant 0 : i32
    return %c0_i32, %c0_i32_0 : i32, i32
  }
  func.func @transform_10(%arg0: i32) -> (i32, i32) {
    %c0_i32 = arith.constant 0 : i32
    %c0_i32_0 = arith.constant 0 : i32
    %c0_i32_1 = arith.constant 0 : i32
    return %c0_i32, %c0_i32_0 : i32, i32
  }
  func.func @transform_11(%arg0: i32) -> (i32, i32) {
    %c0_i32 = arith.constant 0 : i32
    %c0_i32_0 = arith.constant 0 : i32
    %c0_i32_1 = arith.constant 0 : i32
    return %c0_i32, %c0_i32_0 : i32, i32
  }
  func.func @transform_12(%arg0: i32) -> (i32, i32) {
    %c0_i32 = arith.constant 0 : i32
    %c0_i32_0 = arith.constant 0 : i32
    %c0_i32_1 = arith.constant 0 : i32
    return %c0_i32, %c0_i32_0 : i32, i32
  }
  func.func @transform_13(%arg0: i32) -> (i32, i32) {
    %c0_i32 = arith.constant 0 : i32
    %c0_i32_0 = arith.constant 0 : i32
    %c0_i32_1 = arith.constant 0 : i32
    return %c0_i32, %c0_i32_0 : i32, i32
  }
  func.func @transform_14(%arg0: i32) -> (i32, i32) {
    %c0_i32 = arith.constant 0 : i32
    %c0_i32_0 = arith.constant 0 : i32
    %c0_i32_1 = arith.constant 0 : i32
    return %c0_i32, %c0_i32_0 : i32, i32
  }
  func.func @transform_15(%arg0: i32) -> (i32, i32) {
    %c0_i32 = arith.constant 0 : i32
    %c0_i32_0 = arith.constant 0 : i32
    %c0_i32_1 = arith.constant 0 : i32
    return %c0_i32, %c0_i32_0 : i32, i32
  }
  func.func @transform_16(%arg0: i32) -> (i32, i32) {
    %c0_i32 = arith.constant 0 : i32
    %c0_i32_0 = arith.constant 0 : i32
    return %arg0, %c0_i32 : i32, i32
  }
}

</mosaic_0001>

<bundles_post_ra>
// kernel: tpu_custom_call.1
= control target key start
LH: loop header
LB: loop body
LE: loop exit
PB: predicated region body
PF: predicated region fallthrough
CT: control target
= control target key end

     0   :  { %s1129_s0 = inlined_call_operand.vmem [shape: f32[4,17], index: 0, kind: input, shape index: {}]   ;;  %s1130_s1 = inlined_call_operand.vmem [shape: f32[4,18], index: 1, kind: input, shape index: {}]   ;;  %s1131_s2 = inlined_call_operand.vmem [shape: f32[4,8,18], index: 2, kind: input, shape index: {}]   ;;  %s1132_s3 = inlined_call_operand.vmem [shape: s32[4,1], index: 3, kind: input, shape index: {}]   ;;  %s1133_s4 = inlined_call_operand.vmem [shape: bf16[72,32], index: 4, kind: input, shape index: {}]   ;;  %s1134_s5 = inlined_call_operand.vmem [shape: f32[1,32], index: 5, kind: input, shape index: {}]   ;;  %s1135_s6 = inlined_call_operand.vmem [shape: bf16[32,16], index: 6, kind: input, shape index: {}]   ;;  %s1136_s7 = inlined_call_operand.vmem [shape: f32[1,16], index: 7, kind: input, shape index: {}]   ;;  %s1137_s8 = inlined_call_operand.vmem [shape: f32[1,16], index: 8, kind: input, shape index: {}]   ;;  %s1138_s9 = inlined_call_operand.<no memory space> [shape: f32[1,1], index: 9, kind: input, shape index: {}]   ;;  %s1139_s10 = inlined_call_operand.vmem [shape: bf16[53,64], index: 10, kind: input, shape index: {}]   ;;  %s1140_s11 = inlined_call_operand.vmem [shape: f32[1,64], index: 11, kind: input, shape index: {}]   ;;  %s1141_s12 = inlined_call_operand.vmem [shape: bf16[64,32], index: 12, kind: input, shape index: {}]   ;;  %s1142_s13 = inlined_call_operand.vmem [shape: f32[1,32], index: 13, kind: input, shape index: {}]   ;;  %s1143_s14 = inlined_call_operand.vmem [shape: f32[1,32], index: 14, kind: input, shape index: {}]   ;;  %s1144_s16 = inlined_call_operand.hbm [shape: f32[4,128], index: 16, kind: output, shape index: {}]   ;;  %s1145_s15 = inlined_call_operand.<no memory space> [shape: f32[1,1], index: 15, kind: input, shape index: {}]  }
   0x1   :  { %1146 = sst [smem:[#allocation7_spill]] %s1129_s0  ;;  %v21_v0 = vstv %s1138_s9  ;;  %v23_v1 = vstv %s1145_s15 }
   0x2   :  { %22 = vst [vmem:[#allocation2] sm:$0x1] %v21_v0 }
   0x3   :  { %24 = vst [vmem:[#allocation3] sm:$0x1] %v23_v1 }
   0x4   :  { %v961_v2 = vld [vmem:[%s1131_s2] sm:$0xff]  ;;  %v966_v3 = vld [vmem:[%s1131_s2 + $0x8] sm:$0xff]  ;;  %v981_v9 = vld [vmem:[%s1131_s2 + $0x10] sm:$0xff]  ;;  %vm197_vm0 = vcmask 1043456  }
   0x5   :  { %v971_v4 = vld [vmem:[%s1130_s1] sm:$0xf]  ;;  %v772_v5 = vpack.i.bf16 %v966_v3, %v961_v2  ;;  %s859_s1 = smov 18   ;;  %v993_v15 = vld [vmem:[%s1131_s2 + $0x18] sm:$0xff] }
   0x6   :  { %v66_v6 = vrot.slane %v971_v4, 1  ;;  %v69_v7 = vperm.slane %v971_v4, 0  ;;  %v67_v8 = vrot.slane %v971_v4, 2  ;;  %v68_v10 = vrot.slane %v971_v4, 3  ;;  %v158_v11 = vld [vmem:[%s1133_s4 + $0x20] sm:$0xf] }
   0x7   :  { %773 = vrot.lane.b32.xlu0 %v772_v5, %s859_s1  ;;  %v180_v18 = vunpack.c.l.b16 %v158_v11 }
   0x8   :  { %v70_v12 = vperm.slane %v66_v6, 0  ;;  %v81_v13 = vmul.f32 %v69_v7, %v961_v2  ;;  %v77_v14 = vsub.f32 %v69_v7, %v961_v2  ;;  %v995_v16 = vperm.slane %v67_v8, 0 }
   0x9   :  { %v72_v17 = vperm.slane %v68_v10, 0  ;;  %v185_v23 = vpack.c.b16 %v180_v18, %v180_v18 }
   0xa   :  { %v82_v19 = vmul.f32 %v70_v12, %v966_v3  ;;  %v78_v20 = vsub.f32 %v70_v12, %v966_v3  ;;  %v79_v21 = vsub.f32 %v995_v16, %v981_v9 }
   0xb   :  { %v80_v22 = vsub.f32 %v72_v17, %v993_v15 }
   0xc   :  { %25 = vsyncpa [#allocation5], 0  ;;  %v782_v24 = vpack.i.bf16 %v82_v19, %v81_v13  ;;  %v777_v25 = vpack.i.bf16 %v78_v20, %v77_v14  ;;  %v199_v27 = vsel %vm197_vm0, %v185_v23, 0  ;;  %s860_s2 = smov 54   ;;  %v754_v28 = vld [vmem:[%s1133_s4 + $0x18] sm:$0xff]  ;;  %s861_s22 = smov 36   ;;  %v83_v29 = vmul.f32 %v995_v16, %v981_v9 }
   0xd   :  { %v792_v26 = vpack.i.bf16 %v80_v22, %v79_v21  ;;  %204 = vmatpush.bf16.msra.mxu0 %v199_v27  ;;  %v84_v30 = vmul.f32 %v72_v17, %v993_v15  ;;  %v787_v31 = vpack.i.bf16 %v993_v15, %v981_v9  ;;  %v753_v33 = vld [vmem:[%s1133_s4 + $0x10] sm:$0xff]  ;;  %v752_v34 = vld [vmem:[%s1133_s4 + $0x8] sm:$0xff]  ;;  %v751_v35 = vld [vmem:[%s1133_s4] sm:$0xff]  ;;  %vm133_vm1 = vcmask 146432   ;;  %s865_s23 = smov 35   ;;  %s1147_s9 = sld [smem:[#allocation7_spill]] }
   0xe   :  { %783 = vrot.lane.b32.xlu1 %v782_v24, %s860_s2  ;;  %vm138_vm2 = vcmask 293888   ;;  %vm143_vm3 = vcmask 441344   ;;  %vm190_vm4 = vcmask 588800   ;;  %v755_v8 = vld [vmem:[%s1135_s6] sm:$0xff]  ;;  %vm246_vm5 = vcmask 261120   ;;  %s683_s18 = sshll.u32 %s1144_s16, 4  ;;  %s684_s18 = int_to_ptr.hbm [resolvable:$true] %s683_s18 }
   0xf   :  { %793 = vrot.lane.b32.xlu2 %v792_v26, %s861_s22  ;;  %778 = vrot.lane.b32.xlu0 %v777_v25, %s861_s22  ;;  %v797_v32 = vpack.i.bf16 %v84_v30, %v83_v29  ;;  %v805_v11 = vld [vmem:[%s1134_s5] ss:$0 sm:$0xff]  ;;  %vm284_vm6 = vcmask 130048   ;;  %vm323_vm8 = vcmask 7168  }
  0x10   :  { %v806_v26 = vld [vmem:[%s1136_s7] ss:$0 sm:$0xff] }
  0x11   :  { %205 = vmatpush.bf16.msra.mxu0 %v754_v28  ;;  %v807_v29 = vld [vmem:[%s1137_s8] ss:$0 sm:$0xff] }
  0x15   :  { %206 = vmatpush.bf16.msra.mxu0 %v753_v33 }
  0x16   :  { %788 = vrot.lane.b32.xlu1 %v787_v31, %s859_s1 }
  0x17   :  { %798 = vrot.lane.b32.xlu2 %v797_v32, %s860_s2 }
  0x19   :  { %207 = vmatpush.bf16.msra.mxu0 %v752_v34 }
  0x1d   :  { %208 = vmatpush.bf16.msra.mxu0 %v751_v35 }
  0x69   :  { %v794_v45 = vpop.permute.xlu2 %793 }
  0x6a   :  { %v796_v56 = vunpack.i.h.bf16 %v794_v45  ;;  %v795_v57 = vunpack.i.l.bf16 %v794_v45 }
  0x71   :  { %v799_v58 = vpop.permute.xlu2 %798 }
  0x72   :  { %v801_v61 = vunpack.i.h.bf16 %v799_v58  ;;  %v800_v62 = vunpack.i.l.bf16 %v799_v58 }
  0x79   :  { %v774_v36 = vpop.permute.xlu0 %773 }
  0x7a   :  { %v776_v37 = vunpack.i.h.bf16 %v774_v36  ;;  %v775_v38 = vunpack.i.l.bf16 %v774_v36 }
  0x7c   :  { %v134_v46 = vsel %vm133_vm1, %v69_v7, %v775_v38  ;;  %v135_v47 = vsel %vm133_vm1, %v70_v12, %v776_v37  ;;  %v756_v7 = vld [vmem:[%s1135_s6 + $0x8] sm:$0xff] }
  0x7d   :  { %259 = vmatpush.bf16.msra.mxu1 %v756_v7 }
  0x80   :  { %v784_v39 = vpop.permute.xlu1 %783 }
  0x81   :  { %v786_v40 = vunpack.i.h.bf16 %v784_v39  ;;  %v785_v41 = vunpack.i.l.bf16 %v784_v39  ;;  %v779_v42 = vpop.permute.xlu0 %778  ;;  %260 = vmatpush.bf16.msra.mxu1 %v755_v8 }
  0x82   :  { %v781_v43 = vunpack.i.h.bf16 %v779_v42  ;;  %v780_v44 = vunpack.i.l.bf16 %v779_v42 }
  0x84   :  { %v140_v48 = vsel %vm138_vm2, %v135_v47, %v781_v43  ;;  %v139_v49 = vsel %vm138_vm2, %v134_v46, %v780_v44 }
  0x85   :  { %v144_v50 = vsel %vm143_vm3, %v139_v49, %v785_v41  ;;  %v145_v51 = vsel %vm143_vm3, %v140_v48, %v786_v40  ;;  %v306_v48 = vlaneseq  ;;  %v305_v49 = vld [vmem:[%s1132_s3] sm:$0xf]  ;;  %s863_s3 = smov 17  }
  0x86   :  { %v148_v52 = vpack.c.bf16 %v145_v51, %v144_v50  ;;  %v311_v51 = vperm.slane %v305_v49, 0 }
  0x87   :  { %v307_v50 = vshrl.u32 %v306_v48, 7 }
  0x88   :  { %v789_v53 = vpop.permute.xlu1 %788  ;;  %708 = vmatmul.msk.bf16.vlgmr.msra.gmra.mxu0 %vm190_vm4, %v148_v52  ;;  %v808_v52 = vld [vmem:[#allocation2] ss:$0 sm:$0xff] }
  0x89   :  { %v791_v54 = vunpack.i.h.bf16 %v789_v53  ;;  %v790_v55 = vunpack.i.l.bf16 %v789_v53  ;;  %vm315_vm7 = vcmp.lt.s32.totalorder %v307_v50, %v311_v51 }
  0x8b   :  { %v137_v59 = vsel %vm133_vm1, %v72_v17, %v791_v54  ;;  %v136_v60 = vsel %vm133_vm1, %v995_v16, %v790_v55  ;;  %v308_v54 = vrot.slane %v305_v49, 1 }
  0x8c   :  { %v141_v63 = vsel %vm138_vm2, %v136_v60, %v795_v57  ;;  %v142_v0 = vsel %vm138_vm2, %v137_v59, %v796_v56 }
  0x8d   :  { %v146_v1 = vsel %vm143_vm3, %v141_v63, %v800_v62  ;;  %v147_v5 = vsel %vm143_vm3, %v142_v0, %v801_v61  ;;  %v312_v58 = vperm.slane %v308_v54, 0  ;;  %v309_v62 = vrot.slane %v305_v49, 2 }
  0x8e   :  { %v149_v6 = vpack.c.bf16 %v147_v5, %v146_v1 }
  0x8f   :  { %vm316_vm9 = vcmp.lt.s32.totalorder %v307_v50, %v312_v58  ;;  %v313_v7 = vperm.slane %v309_v62, 0 }
  0x91   :  { %vm317_vm10 = vcmp.lt.s32.totalorder %v307_v50, %v313_v7 }
  0x98   :  { %709 = vmatmul.msk.bf16.gmra.mxu0 %vm190_vm4, %v149_v6 }
 0x105   :  { %v210_v10 = vpop.f32.mrf.mxu0 }
 0x106   :  { %v211_v12 = vadd.f32 %v805_v11, %v210_v10 }
 0x108   :  { %v220_v16 = vmax.f32 %v211_v12, 0.0 }
 0x10d   :  { %v212_v13 = vpop.f32.mrf.mxu0 }
 0x10e   :  { %v213_v14 = vadd.f32 %v805_v11, %v212_v13 }
 0x110   :  { %v221_v17 = vmax.f32 %v213_v14, 0.0  ;;  %v310_v14 = vrot.slane %v305_v49, 3 }
 0x112   :  { %v224_v18 = vpack.c.bf16 %v221_v17, %v220_v16 }
 0x114   :  { %718 = vmatmul.msk.bf16.vlgmr.msra.gmra.mxu1 %vm246_vm5, %v224_v18 }
 0x115   :  { %v215_v19 = vpop.f32.mrf.mxu0 }
 0x116   :  { %v216_v20 = vadd.f32 %v805_v11, %v215_v19 }
 0x118   :  { %v222_v23 = vmax.f32 %v216_v20, 0.0 }
 0x11d   :  { %v217_v21 = vpop.f32.mrf.mxu0 }
 0x11e   :  { %v218_v22 = vadd.f32 %v805_v11, %v217_v21 }
 0x120   :  { %v223_v24 = vmax.f32 %v218_v22, 0.0 }
 0x122   :  { %v225_v25 = vpack.c.bf16 %v223_v24, %v222_v23  ;;  %v314_v23 = vperm.slane %v310_v14, 0 }
 0x124   :  { %719 = vmatmul.msk.bf16.gmra.mxu1 %vm246_vm5, %v225_v25  ;;  %vm318_vm11 = vcmp.lt.s32.totalorder %v307_v50, %v314_v23 }
 0x191   :  { %v262_v27 = vpop.f32.mrf.mxu1 }
 0x192   :  { %v263_v28 = vadd.f32 %v806_v26, %v262_v27 }
 0x194   :  { %v272_v30 = vmax.f32 %v263_v28, 0.0 }
 0x196   :  { %v280_v31 = vmul.f32 %v807_v29, %v272_v30 }
 0x198   :  { %v285_v32 = vsel %vm284_vm6, %v280_v31, 0.0 }
 0x199   :  { %v264_v33 = vpop.f32.mrf.mxu1  ;;  %286 = vadd.xlane.f32.xlu0 %v285_v32 }
 0x19a   :  { %v265_v34 = vadd.f32 %v806_v26, %v264_v33 }
 0x19c   :  { %v273_v35 = vmax.f32 %v265_v34, 0.0 }
 0x19e   :  { %v281_v36 = vmul.f32 %v807_v29, %v273_v35 }
 0x1a0   :  { %v288_v37 = vsel %vm284_vm6, %v281_v36, 0.0  ;;  %v862_v36 = vmov 0  }
 0x1a1   :  { %v267_v38 = vpop.f32.mrf.mxu1  ;;  %289 = vadd.xlane.f32.xlu1 %v288_v37  ;;  %802 = vset.pattern.permute.xlu0 %v862_v36 }
 0x1a2   :  { %v268_v39 = vadd.f32 %v806_v26, %v267_v38  ;;  %803 = vset.pattern.permute.xlu1 %v862_v36  ;;  %804 = vset.pattern.permute.xlu2 %v862_v36 }
 0x1a4   :  { %v274_v40 = vmax.f32 %v268_v39, 0.0 }
 0x1a6   :  { %v282_v41 = vmul.f32 %v807_v29, %v274_v40 }
 0x1a8   :  { %v291_v42 = vsel %vm284_vm6, %v282_v41, 0.0 }
 0x1a9   :  { %v269_v43 = vpop.f32.mrf.mxu1  ;;  %292 = vadd.xlane.f32.xlu2 %v291_v42 }
 0x1aa   :  { %v270_v44 = vadd.f32 %v806_v26, %v269_v43 }
 0x1ac   :  { %v275_v45 = vmax.f32 %v270_v44, 0.0 }
 0x1ae   :  { %v283_v46 = vmul.f32 %v807_v29, %v275_v45 }
 0x1b0   :  { %v294_v47 = vsel %vm284_vm6, %v283_v46, 0.0 }
 0x1b1   :  { %295 = vadd.xlane.f32.xlu2 %v294_v47 }
 0x20c   :  { %v287_v53 = vpop.xlane.xlu0 %286 }
 0x20d   :  { %v301_v55 = vadd.f32 %v808_v52, %v287_v53 }
 0x20f   :  { %v319_v56 = vsel %vm315_vm7, %v301_v55, -4.2949673e+09 }
 0x210   :  { %v324_v57 = vsel %vm323_vm8, %v319_v56, -inf }
 0x211   :  { %v325_v59 = vrot.slane %v324_v57, 4 }
 0x213   :  { %v326_v60 = vmax.f32 %v324_v57, %v325_v59 }
 0x214   :  { %v290_v61 = vpop.xlane.xlu1 %289 }
 0x215   :  { %v327_v63 = vrot.slane %v326_v60, 2  ;;  %v302_v0 = vadd.f32 %v808_v52, %v290_v61 }
 0x217   :  { %v328_v1 = vmax.f32 %v326_v60, %v327_v63  ;;  %v320_v5 = vsel %vm316_vm9, %v302_v0, -4.2949673e+09 }
 0x218   :  { %v331_v6 = vsel %vm323_vm8, %v320_v5, -inf }
 0x219   :  { %v329_v8 = vrot.slane %v328_v1, 1  ;;  %v332_v10 = vrot.slane %v331_v6, 4 }
 0x21b   :  { %v330_v11 = vmax.f32 %v328_v1, %v329_v8  ;;  %v333_v12 = vmax.f32 %v331_v6, %v332_v10 }
 0x21c   :  { %v293_v13 = vpop.xlane.xlu2 %292 }
 0x21d   :  { %v352_v16 = vsub.f32 %v319_v56, %v330_v11  ;;  %v334_v17 = vrot.slane %v333_v12, 2  ;;  %v303_v18 = vadd.f32 %v808_v52, %v293_v13 }
 0x21f   :  { %v356_v19 = vmul.f32 1.442695, %v352_v16  ;;  %v335_v20 = vmax.f32 %v333_v12, %v334_v17  ;;  %v321_v21 = vsel %vm317_vm10, %v303_v18, -4.2949673e+09 }
 0x220   :  { %v338_v22 = vsel %vm323_vm8, %v321_v21, -inf }
 0x221   :  { %813 = vpow2.f32 %v356_v19  ;;  %v336_v24 = vrot.slane %v335_v20, 1  ;;  %v339_v25 = vrot.slane %v338_v22, 4 }
 0x223   :  { %v337_v26 = vmax.f32 %v335_v20, %v336_v24  ;;  %v340_v27 = vmax.f32 %v338_v22, %v339_v25 }
 0x224   :  { %v296_v28 = vpop.xlane.xlu2 %295 }
 0x225   :  { %v353_v29 = vsub.f32 %v320_v5, %v337_v26  ;;  %v341_v30 = vrot.slane %v340_v27, 2  ;;  %v304_v31 = vadd.f32 %v808_v52, %v296_v28 }
 0x227   :  { %v1060_v32 = vpop.eup %813  ;;  %v358_v33 = vmul.f32 1.442695, %v353_v29  ;;  %v342_v34 = vmax.f32 %v340_v27, %v341_v30  ;;  %v322_v35 = vsel %vm318_vm11, %v304_v31, -4.2949673e+09 }
 0x228   :  { %v364_v37 = vsel %vm323_vm8, %v1060_v32, 0.0  ;;  %v345_v38 = vsel %vm323_vm8, %v322_v35, -inf }
 0x229   :  { %v365_v39 = vrot.slane %v364_v37, 4  ;;  %815 = vpow2.f32 %v358_v33  ;;  %v343_v40 = vrot.slane %v342_v34, 1  ;;  %v346_v41 = vrot.slane %v345_v38, 4 }
 0x22b   :  { %v366_v42 = vadd.f32 %v365_v39, %v364_v37  ;;  %v344_v43 = vmax.f32 %v342_v34, %v343_v40  ;;  %v347_v44 = vmax.f32 %v345_v38, %v346_v41 }
 0x22d   :  { %v367_v45 = vrot.slane %v366_v42, 2  ;;  %v354_v46 = vsub.f32 %v321_v21, %v344_v43  ;;  %v348_v47 = vrot.slane %v347_v44, 2 }
 0x22f   :  { %v1065_v48 = vpop.eup %815  ;;  %v368_v49 = vadd.f32 %v367_v45, %v366_v42  ;;  %v360_v50 = vmul.f32 1.442695, %v354_v46  ;;  %v349_v51 = vmax.f32 %v347_v44, %v348_v47 }
 0x230   :  { %v371_v52 = vsel %vm323_vm8, %v1065_v48, 0.0 }
 0x231   :  { %v369_v53 = vrot.slane %v368_v49, 1  ;;  %v372_v54 = vrot.slane %v371_v52, 4  ;;  %817 = vpow2.f32 %v360_v50  ;;  %v350_v55 = vrot.slane %v349_v51, 1 }
 0x233   :  { %v370_v56 = vadd.f32 %v369_v53, %v368_v49  ;;  %v373_v57 = vadd.f32 %v372_v54, %v371_v52  ;;  %v351_v58 = vmax.f32 %v349_v51, %v350_v55 }
 0x235   :  { %819 = vrcp.f32 %v370_v56  ;;  %v374_v59 = vrot.slane %v373_v57, 2  ;;  %v355_v60 = vsub.f32 %v322_v35, %v351_v58  ;;  %v403_v16 = vand.u32 2147483648, %v370_v56 }
 0x236   :  { %v401_v19 = vand.u32 2147483647, %v370_v56  ;;  %vm397_vm13 = vweird.f32 %v370_v56 }
 0x237   :  { %v1069_v61 = vpop.eup %817  ;;  %v375_v62 = vadd.f32 %v374_v59, %v373_v57  ;;  %v362_v63 = vmul.f32 1.442695, %v355_v60  ;;  %v404_v26 = vor.u32 1.1754944e-38, %v403_v16 }
 0x238   :  { %v378_v0 = vsel %vm323_vm8, %v1069_v61, 0.0  ;;  %vm402_vm15 = vcmp.eq.f32.partialorder %v401_v19, 8.507059e+37 }
 0x239   :  { %v376_v1 = vrot.slane %v375_v62, 1  ;;  %v379_v5 = vrot.slane %v378_v0, 4  ;;  %821 = vpow2.f32 %v362_v63 }
 0x23b   :  { %v820_v6 = vpop.eup %819  ;;  %v377_v7 = vadd.f32 %v376_v1, %v375_v62  ;;  %v380_v8 = vadd.f32 %v379_v5, %v378_v0 }
 0x23c   :  { %v393_v10 = vmul.f32 %v820_v6, %v370_v56  ;;  %vm398_vm12 = vweird.f32 %v820_v6 }
 0x23d   :  { %823 = vrcp.f32 %v377_v7  ;;  %v381_v11 = vrot.slane %v380_v8, 2  ;;  %vm399_vm14 = vmor %vm397_vm13, %vm398_vm12  ;;  %v418_v35 = vand.u32 2147483648, %v377_v7  ;;  %v416_v37 = vand.u32 2147483647, %v377_v7 }
 0x23e   :  { %v394_v12 = vsub.f32 1.0, %v393_v10  ;;  %vm412_vm2 = vweird.f32 %v377_v7  ;;  %vm561_vm13 = vcmask 1041408  }
 0x23f   :  { %v1073_v13 = vpop.eup %821  ;;  %v382_v14 = vadd.f32 %v381_v11, %v380_v8  ;;  %v419_v42 = vor.u32 1.1754944e-38, %v418_v35  ;;  %vm417_vm4 = vcmp.eq.f32.partialorder %v416_v37, 8.507059e+37  ;;  %v531_v11 = vld [vmem:[%s1139_s10 + $0x18] sm:$0x7] }
 0x240   :  { %v385_v17 = vsel %vm323_vm8, %v1073_v13, 0.0  ;;  %v395_v18 = vmul.f32 %v820_v6, %v394_v12 }
 0x241   :  { %v383_v20 = vrot.slane %v382_v14, 1  ;;  %v386_v21 = vrot.slane %v385_v17, 4 }
 0x242   :  { %v396_v22 = vadd.f32 %v820_v6, %v395_v18 }
 0x243   :  { %v824_v23 = vpop.eup %823  ;;  %v384_v24 = vadd.f32 %v383_v20, %v382_v14  ;;  %v387_v25 = vadd.f32 %v386_v21, %v385_v17  ;;  %v864_v14 = vmov 65535  }
 0x244   :  { %v400_v27 = vsel %vm399_vm14, %v820_v6, %v396_v22  ;;  %v408_v28 = vmul.f32 %v824_v23, %v377_v7  ;;  %vm413_vm0 = vweird.f32 %v824_v23  ;;  %vm562_vm14 = vcmask 1042432  }
 0x245   :  { %825 = vrcp.f32 %v384_v24  ;;  %v388_v29 = vrot.slane %v387_v25, 2  ;;  %v405_v30 = vsel %vm402_vm15, %v404_v26, %v400_v27  ;;  %vm414_vm3 = vmor %vm412_vm2, %vm413_vm0  ;;  %v433_v47 = vand.u32 2147483648, %v384_v24  ;;  %v758_v26 = vld [vmem:[%s1139_s10 + $0x8] sm:$0xff] }
 0x246   :  { %v406_v31 = vmul.f32 %v1060_v32, %v405_v30  ;;  %v409_v33 = vsub.f32 1.0, %v408_v28  ;;  %v431_v50 = vand.u32 2147483647, %v384_v24  ;;  %vm427_vm6 = vweird.f32 %v384_v24 }
 0x247   :  { %v389_v34 = vadd.f32 %v388_v29, %v387_v25  ;;  %v434_v53 = vor.u32 1.1754944e-38, %v433_v47  ;;  %v563_v16 = vsel %vm561_vm13, 4294967295, %v864_v14  ;;  %vm511_vm15 = vcmask 1041409  }
 0x248   :  { %454 = vperm.xlu0 %802, %v406_v31   ;;  %v410_v36 = vmul.f32 %v824_v23, %v409_v33  ;;  %vm432_vm8 = vcmp.eq.f32.partialorder %v431_v50, 8.507059e+37  ;;  %v564_v18 = vsel %vm562_vm14, %v563_v16, 0  ;;  %vm513_vm0 = vcmask 1042434   ;;  %v812_v16 = vld [vmem:[#allocation3] ss:$0 sm:$0xff] }
 0x249   :  { %v390_v38 = vrot.slane %v389_v34, 1  ;;  %vm515_vm2 = vcmask 1043459  }
 0x24a   :  { %v411_v39 = vadd.f32 %v824_v23, %v410_v36 }
 0x24b   :  { %v826_v40 = vpop.eup %825  ;;  %v391_v41 = vadd.f32 %v390_v38, %v389_v34 }
 0x24c   :  { %v415_v43 = vsel %vm414_vm3, %v824_v23, %v411_v39  ;;  %v423_v44 = vmul.f32 %v826_v40, %v384_v24  ;;  %vm428_vm5 = vweird.f32 %v826_v40  ;;  %vm522_vm3 = vcmask 285696  }
 0x24d   :  { %827 = vrcp.f32 %v391_v41  ;;  %v420_v45 = vsel %vm417_vm4, %v419_v42, %v415_v43  ;;  %vm429_vm7 = vmor %vm427_vm6, %vm428_vm5  ;;  %v448_v59 = vand.u32 2147483648, %v391_v41  ;;  %v446_v60 = vand.u32 2147483647, %v391_v41 }
 0x24e   :  { %v421_v32 = vmul.f32 %v1065_v48, %v420_v45  ;;  %v424_v46 = vsub.f32 1.0, %v423_v44  ;;  %vm442_vm10 = vweird.f32 %v391_v41  ;;  %vm557_vm4 = vcmask 433152  }
 0x24f   :  { %v449_v63 = vor.u32 1.1754944e-38, %v448_v59  ;;  %vm447_vm12 = vcmp.eq.f32.partialorder %v446_v60, 8.507059e+37  ;;  %v760_v60 = vld [vmem:[%s1141_s12] sm:$0xff]  ;;  %vm619_vm5 = vcmask 523264   ;;  %vm642_vm6 = vcmask 257024  }
 0x250   :  { %459 = vperm.xlu1 %803, %v421_v32   ;;  %v425_v49 = vmul.f32 %v826_v40, %v424_v46 }
 0x252   :  { %v426_v51 = vadd.f32 %v826_v40, %v425_v49 }
 0x253   :  { %v828_v52 = vpop.eup %827 }
 0x254   :  { %v430_v54 = vsel %vm429_vm7, %v826_v40, %v426_v51  ;;  %v438_v55 = vmul.f32 %v828_v52, %v391_v41  ;;  %vm443_vm9 = vweird.f32 %v828_v52  ;;  %v757_v51 = vld [vmem:[%s1139_s10] sm:$0xff] }
 0x255   :  { %v435_v56 = vsel %vm432_vm8, %v434_v53, %v430_v54  ;;  %vm444_vm11 = vmor %vm442_vm10, %vm443_vm9  ;;  %v762_v53 = vld [vmem:[%s1141_s12 + $0x10] sm:$0xff] }
 0x256   :  { %v436_v57 = vmul.f32 %v1069_v61, %v435_v56  ;;  %v439_v58 = vsub.f32 1.0, %v438_v55  ;;  %v59_v55 = vld [vmem:[%s1147_s9] sm:$0xf] }
 0x258   :  { %464 = vperm.xlu2 %804, %v436_v57   ;;  %v440_v48 = vmul.f32 %v828_v52, %v439_v58 }
 0x25a   :  { %v441_v62 = vadd.f32 %v828_v52, %v440_v48  ;;  %v761_v48 = vld [vmem:[%s1141_s12 + $0x8] sm:$0xff] }
 0x25c   :  { %v445_v0 = vsel %vm444_vm11, %v828_v52, %v441_v62  ;;  %v763_v52 = vld [vmem:[%s1141_s12 + $0x18] sm:$0xff]  ;;  %v809_v62 = vld [vmem:[%s1140_s11] ss:$0 sm:$0xff]  ;;  %s866_s11 = smov [#allocation4]  }
 0x25d   :  { %v450_v1 = vsel %vm447_vm12, %v449_v63, %v445_v0  ;;  %627 = vmatpush.bf16.msra.mxu3 %v763_v52 }
 0x25e   :  { %v451_v5 = vmul.f32 %v1073_v13, %v450_v1  ;;  %v549_v13 = vunpack.c.l.b16 %v531_v11 }
 0x260   :  { %469 = vperm.xlu1 %803, %v451_v5   ;;  %504 = vrot.lane.b32.xlu2 %v971_v4, %s863_s3  ;;  %v553_v19 = vpack.c.b16 %v549_v13, %v549_v13 }
 0x261   :  { %628 = vmatpush.bf16.msra.mxu3 %v762_v53 }
 0x262   :  { %v566_v21 = vand.u32 %v564_v18, %v553_v19 }
 0x264   :  { %572 = vmatpush.bf16.msra.mxu2 %v566_v21 }
 0x265   :  { %629 = vmatpush.bf16.msra.mxu3 %v761_v48 }
 0x269   :  { %630 = vmatpush.bf16.msra.mxu3 %v760_v60 }
 0x2b2   :  { %v465_v6 = vpop.permute.xlu2 %464 }
 0x2b3   :  { %v474_v12 = vmul.f32 %v465_v6, %v981_v9  ;;  %v759_v9 = vld [vmem:[%s1139_s10 + $0x10] sm:$0xff]  ;;  %v810_v6 = vld [vmem:[%s1142_s13] ss:$0 sm:$0xff]  ;;  %s681_s13 = sshll.u32 %s866_s11, 4  ;;  %s682_s13 = int_to_ptr.vmem [resolvable:$true] %s681_s13 }
 0x2b4   :  { %573 = vmatpush.bf16.msra.mxu2 %v759_v9 }
 0x2b8   :  { %574 = vmatpush.bf16.msra.mxu2 %v758_v26 }
 0x2ba   :  { %v455_v61 = vpop.permute.xlu0 %454  ;;  %v505_v54 = vpop.permute.xlu2 %504 }
 0x2bb   :  { %v472_v7 = vmul.f32 %v455_v61, %v961_v2 }
 0x2bc   :  { %575 = vmatpush.bf16.msra.mxu2 %v757_v51 }
 0x2bd   :  { %v476_v4 = vsel %vm133_vm1, %v472_v7, 0.0 }
 0x2be   :  { %v477_v20 = vrot.slane %v476_v4, 4 }
 0x2c0   :  { %v478_v24 = vadd.f32 %v477_v20, %v476_v4 }
 0x2c2   :  { %v460_v8 = vpop.permute.xlu1 %459  ;;  %v479_v28 = vrot.slane %v478_v24, 2 }
 0x2c3   :  { %v473_v10 = vmul.f32 %v460_v8, %v966_v3  ;;  %v490_v3 = vsel %vm133_vm1, %v474_v12, 0.0 }
 0x2c4   :  { %v491_v23 = vrot.slane %v490_v3, 4  ;;  %v480_v34 = vadd.f32 %v479_v28, %v478_v24 }
 0x2c5   :  { %v483_v17 = vsel %vm133_vm1, %v473_v10, 0.0  ;;  %v811_v10 = vld [vmem:[%s1143_s14] ss:$0 sm:$0xff] }
 0x2c6   :  { %v484_v2 = vrot.slane %v483_v17, 4  ;;  %v492_v27 = vadd.f32 %v491_v23, %v490_v3  ;;  %v481_v39 = vrot.slane %v480_v34, 1 }
 0x2c8   :  { %v485_v22 = vadd.f32 %v484_v2, %v483_v17  ;;  %v493_v31 = vrot.slane %v492_v27, 2  ;;  %v482_v44 = vadd.f32 %v481_v39, %v480_v34 }
 0x2ca   :  { %v486_v25 = vrot.slane %v485_v22, 2  ;;  %v494_v38 = vadd.f32 %v493_v31, %v492_v27 }
 0x2cc   :  { %v487_v29 = vadd.f32 %v486_v25, %v485_v22  ;;  %v495_v43 = vrot.slane %v494_v38, 1 }
 0x2ce   :  { %v488_v36 = vrot.slane %v487_v29, 1  ;;  %v496_v47 = vadd.f32 %v495_v43, %v494_v38 }
 0x2d0   :  { %v489_v41 = vadd.f32 %v488_v36, %v487_v29 }
 0x2d2   :  { %v470_v30 = vpop.permute.xlu1 %469  ;;  %v512_v46 = vsel %vm511_vm15, %v489_v41, %v482_v44 }
 0x2d3   :  { %v475_v33 = vmul.f32 %v470_v30, %v993_v15  ;;  %v514_v49 = vsel %vm513_vm0, %v496_v47, %v512_v46 }
 0x2d5   :  { %v497_v35 = vsel %vm133_vm1, %v475_v33, 0.0  ;;  %vm520_vm1 = vcmask 138240  }
 0x2d6   :  { %v498_v37 = vrot.slane %v497_v35, 4  ;;  %v521_v56 = vsel %vm520_vm1, %v59_v55, %v505_v54 }
 0x2d8   :  { %v499_v40 = vadd.f32 %v498_v37, %v497_v35 }
 0x2da   :  { %v500_v42 = vrot.slane %v499_v40, 2 }
 0x2dc   :  { %v501_v45 = vadd.f32 %v500_v42, %v499_v40 }
 0x2de   :  { %v502_v32 = vrot.slane %v501_v45, 1 }
 0x2e0   :  { %v503_v15 = vadd.f32 %v502_v32, %v501_v45 }
 0x2e2   :  { %v516_v50 = vsel %vm515_vm2, %v503_v15, %v514_v49 }
 0x2e3   :  { %517 = vrot.lane.b32.xlu1 %v516_v50, %s865_s23 }
 0x355   :  { %v518_v57 = vpop.permute.xlu1 %517 }
 0x356   :  { %v523_v58 = vsel %vm522_vm3, %v521_v56, %v518_v57 }
 0x357   :  { %v524_v59 = vpack.c.bf16 %v523_v58, %v523_v58 }
 0x359   :  { %732 = vmatmul.msk.bf16.vlgmr.msra.gmra.mxu2 %vm557_vm4, %v524_v59 }
 0x3dc   :  { %v577_v63 = vpop.f32.mrf.mxu2 }
 0x3dd   :  { %v578_v0 = vadd.f32 %v809_v62, %v577_v63 }
 0x3df   :  { %v581_v1 = vmax.f32 %v578_v0, 0.0 }
 0x3e1   :  { %v582_v5 = vpack.c.bf16 %v581_v1, %v581_v1 }
 0x3e3   :  { %749 = vmatmul.msk.bf16.vlgmr.msra.gmra.mxu3 %vm619_vm5, %v582_v5 }
 0x3e4   :  { %v579_v61 = vpop.f32.mrf.mxu2 }
 0x466   :  { %v632_v7 = vpop.f32.mrf.mxu3 }
 0x467   :  { %v633_v8 = vadd.f32 %v810_v6, %v632_v7 }
 0x469   :  { %v636_v11 = vmax.f32 %v633_v8, 0.0 }
 0x46b   :  { %v641_v12 = vmul.f32 %v811_v10, %v636_v11 }
 0x46d   :  { %v643_v13 = vsel %vm642_vm6, %v641_v12, 0.0 }
 0x46e   :  { %v634_v14 = vpop.f32.mrf.mxu3  ;;  %644 = vadd.xlane.f32.xlu2 %v643_v13 }
 0x4e1   :  { %v645_v4 = vpop.xlane.xlu2 %644 }
 0x4e2   :  { %v650_v17 = vadd.f32 %v812_v16, %v645_v4 }
 0x4e4   :  { %v750_v18 = vmul.f32 -1.442695, %v650_v17 }
 0x4e6   :  { %829 = vpow2.f32 %v750_v18 }
 0x4ec   :  { %v830_v2 = vpop.eup %829 }
 0x4ed   :  { %v654_v19 = vadd.f32 1.0, %v830_v2 }
 0x4ef   :  { %831 = vrcp.f32 %v654_v19  ;;  %v666_v22 = vand.u32 2147483648, %v654_v19  ;;  %v664_v23 = vand.u32 2147483647, %v654_v19  ;;  %vm660_vm8 = vweird.f32 %v654_v19 }
 0x4f1   :  { %v667_v25 = vor.u32 1.1754944e-38, %v666_v22  ;;  %vm665_vm10 = vcmp.eq.f32.partialorder %v664_v23, 8.507059e+37 }
 0x4f5   :  { %v832_v3 = vpop.eup %831 }
 0x4f6   :  { %v656_v20 = vmul.f32 %v832_v3, %v654_v19  ;;  %vm661_vm7 = vweird.f32 %v832_v3 }
 0x4f7   :  { %vm662_vm9 = vmor %vm660_vm8, %vm661_vm7 }
 0x4f8   :  { %v657_v21 = vsub.f32 1.0, %v656_v20 }
 0x4fa   :  { %v658_v9 = vmul.f32 %v832_v3, %v657_v21 }
 0x4fc   :  { %v659_v24 = vadd.f32 %v832_v3, %v658_v9 }
 0x4fe   :  { %v663_v26 = vsel %vm662_vm9, %v832_v3, %v659_v24 }
 0x4ff   :  { %v668_v27 = vsel %vm665_vm10, %v667_v25, %v663_v26 }
 0x500   :  { %672 = vperm.xlu0 %802, %v668_v27  }
 0x572   :  { %v673_v28 = vpop.permute.xlu0 %672 }
 0x573   :  { %675 = vst [vmem:[#allocation4] sm:$0xf] %v673_v28 }
 0x574   :  { %686 = dma.vmem_to_hbm [thread:$0]  %s682_s13, 64, %s684_s18, [#allocation5]  }
 0x575   :  { %857 = dma.done.wait [#allocation5], 64  }
 0x576   :  { %858 = vsyncadd [#allocation5], 4294967232 }
 0x577   :  { %691 = vsyncpa [#allocation5], 1 }

</bundles_post_ra>
